<compile_context>
chip_gen: v6e
topology: v6e:2x2x1
jax: 0.10.0
libtpu: 0.0.40
codegen_flags: <defaults>
</compile_context>

<pallas_src>
import functools
import math

import jax
import jax.numpy as jnp
from jax import lax
from jax.experimental import pallas as pl
from jax.experimental.pallas import tpu as pltpu

_MASK_VALUE = -1e30

# Tile-selection budget for double-buffered I/O tiles + scratch.  Kept well
# under v7x's 64 MiB physical VMEM; the scoped limit requested below covers it
# on every generation (raises v5e's 16 MiB scoped default).
_TILE_VMEM_BUDGET = 32 * 1024 * 1024
_VMEM_LIMIT_BYTES = 48 * 1024 * 1024


def _cdiv(a, b):
    return (a + b - 1) // b


def _round_up(x, m):
    return _cdiv(x, m) * m


def _sublane_multiple(dtype):
    # f32 -> 8, bf16 -> 16, int8/fp8 -> 32 (packed-tile layout rules).
    return {4: 8, 2: 16, 1: 32}.get(jnp.dtype(dtype).itemsize, 8)


def _pick_tile(length, block, sub):
    """Balanced tile <= block: minimizes pad waste, 128-multiple when >= 128."""
    if length <= block:
        return _round_up(length, sub)
    n_tiles = _cdiv(length, block)
    t = _cdiv(length, n_tiles)
    t = _round_up(t, 128 if t > 128 else sub)
    return min(t, block)


def _vmem_bytes(tq, tk, d, dv, in_bytes):
    io = 2 * (tq * d + tk * d + tk * dv + tq * dv) * in_bytes      # dbl-buffered tiles
    scr = (2 * tq * 128 + tq * dv) * 4 + tq * d * in_bytes          # m, l, acc, scaled q
    return io + scr


def _lane_broadcast(x, n):
    """x: (rows, 128) lane-replicated -> (rows, n) without cross-lane relayout
    in the common cases (n == 128, n a multiple of 128, or n < 128)."""
    if n == 128:
        return x
    if n % 128 == 0:
        return jnp.tile(x, (1, n // 128))
    if n < 128:
        return x[:, :n]
    return jnp.broadcast_to(x[:, :1], (x.shape[0], n))


def _flash_attn_kernel(q_ref, k_ref, v_ref, o_ref,
                       m_scr, l_scr, acc_scr, q_scr,
                       *, scale, block_k, kv_len, mm_dtype):
    kv = pl.program_id(2)
    last_kv = pl.num_programs(2) - 1

    @pl.when(kv == 0)
    def _init():
        m_scr[...] = jnp.full_like(m_scr, -jnp.inf)
        l_scr[...] = jnp.zeros_like(l_scr)
        acc_scr[...] = jnp.zeros_like(acc_scr)
        # Fold 1/sqrt(D) into q once per q-tile (q block is resident across
        # the whole KV loop, so don't re-multiply every kv step).
        q_scr[...] = (q_ref[...] * scale).astype(q_scr.dtype)

    k = k_ref[...].astype(mm_dtype)
    # Contract on D directly — no k.T / XLU transpose before the MXU.
    s = lax.dot_general(q_scr[...], k, (((1,), (1,)), ((), ())),
                        preferred_element_type=jnp.float32)          # (TQ, TK) f32

    def _update(s_blk):
        m_prev = m_scr[...]                                           # (TQ, 128)
        m_cur = jnp.max(s_blk, axis=-1, keepdims=True)                # (TQ, 1)
        m_new = jnp.maximum(m_prev, m_cur)                            # (TQ, 128)
        alpha = jnp.exp(m_prev - m_new)                               # (TQ, 128)
        p = jnp.exp(s_blk - _lane_broadcast(m_new, s_blk.shape[-1]))  # (TQ, TK)
        l_scr[...] = alpha * l_scr[...] + jnp.sum(p, axis=-1, keepdims=True)
        pv = jnp.dot(p.astype(mm_dtype), v_ref[...].astype(mm_dtype),
                     preferred_element_type=jnp.float32)              # (TQ, Dv)
        acc_scr[...] = (_lane_broadcast(alpha, acc_scr.shape[-1]) * acc_scr[...]
                        + pv)
        m_scr[...] = m_new

    if kv_len is not None:
        # Padded key columns only ever live in the final KV tile — gate the
        # iota/compare/select so every other step skips that VPU work.
        @pl.when(kv == last_kv)
        def _tail():
            col = kv * block_k + lax.broadcasted_iota(jnp.int32, s.shape, 1)
            _update(jnp.where(col < kv_len, s, _MASK_VALUE))

        @pl.when(kv != last_kv)
        def _body():
            _update(s)
    else:
        _update(s)

    @pl.when(kv == last_kv)
    def _finalize():
        # Deferred normalization: approx reciprocal on the EUP slot + one
        # Newton step restores ~f32 accuracy; multiply over Dv (<< Lk).
        l = l_scr[...]
        r = pl.reciprocal(l, approx=True)
        r = r * (2.0 - l * r)
        o_ref[...] = (acc_scr[...]
                      * _lane_broadcast(r, o_ref.shape[-1])).astype(o_ref.dtype)


def dot_attention(query, key, value, *, block_q=256, block_k=512,
                  use_bf16_matmul=False, kv_buffers=None):
    """softmax(Q K^T / sqrt(D)) V.

    query: (B, Lq, D), key: (B, Lk, D), value: (B, Lk, Dv) -> (B, Lq, Dv)
    """
    B, Lq, D = query.shape
    Bk, Lk, Dk = key.shape
    Bv, Lkv, Dv = value.shape
    assert B == Bk == Bv and D == Dk and Lk == Lkv

    scale = 1.0 / math.sqrt(D)
    in_bytes = jnp.dtype(query.dtype).itemsize
    sub = _sublane_multiple(query.dtype)

    mm_dtype = (jnp.bfloat16
                if (use_bf16_matmul and query.dtype == jnp.float32)
                else query.dtype)

    # Tile sizes: overhead-amortizing defaults, balanced against the sequence
    # lengths, then shrunk to fit the explicit VMEM budget.
    tq = _pick_tile(Lq, block_q, sub)
    tk = _pick_tile(Lk, block_k, sub)
    while tk > sub and _vmem_bytes(tq, tk, D, Dv, in_bytes) > _TILE_VMEM_BUDGET:
        tk = max(sub, _round_up(tk // 2, sub))
    while tq > sub and _vmem_bytes(tq, tk, D, Dv, in_bytes) > _TILE_VMEM_BUDGET:
        tq = max(sub, _round_up(tq // 2, sub))

    lq_pad = _round_up(Lq, tq)
    lk_pad = _round_up(Lk, tk)

    # v7x has 2 TensorCores and only the parallel (B, qi) axes shard across
    # them — make sure there are at least 2 parallel work items.
    if B * _cdiv(lq_pad, tq) < 2 and Lq > sub:
        tq_half = _round_up(_cdiv(Lq, 2), sub)
        if sub <= tq_half < tq:
            tq = tq_half
            lq_pad = _round_up(Lq, tq)

    q = query if lq_pad == Lq else jnp.pad(query, ((0, 0), (0, lq_pad - Lq), (0, 0)))
    k = key if lk_pad == Lk else jnp.pad(key, ((0, 0), (0, lk_pad - Lk), (0, 0)))
    v = value if lk_pad == Lk else jnp.pad(value, ((0, 0), (0, lk_pad - Lk), (0, 0)))

    kernel = functools.partial(
        _flash_attn_kernel,
        scale=scale,
        block_k=tk,
        kv_len=Lk if lk_pad != Lk else None,   # only mask when padding exists
        mm_dtype=mm_dtype,
    )

    grid = (B, lq_pad // tq, lk_pad // tk)
    kv_mode = {} if kv_buffers is None else dict(pipeline_mode=pl.Buffered(kv_buffers))

    out = pl.pallas_call(
        kernel,
        out_shape=jax.ShapeDtypeStruct((B, lq_pad, Dv), query.dtype),
        grid_spec=pltpu.PrefetchScalarGridSpec(
            num_scalar_prefetch=0,
            grid=grid,
            in_specs=[
                # Leading batch dim squeezed (None) -> kernel refs are 2D.
                pl.BlockSpec((None, tq, D), lambda b, qi, ki: (b, qi, 0)),
                pl.BlockSpec((None, tk, D), lambda b, qi, ki: (b, ki, 0), **kv_mode),
                pl.BlockSpec((None, tk, Dv), lambda b, qi, ki: (b, ki, 0), **kv_mode),
            ],
            out_specs=pl.BlockSpec((None, tq, Dv), lambda b, qi, ki: (b, qi, 0)),
            scratch_shapes=[
                pltpu.VMEM((tq, 128), jnp.float32),   # running max m (lane-replicated)
                pltpu.VMEM((tq, 128), jnp.float32),   # running sum l (lane-replicated)
                pltpu.VMEM((tq, Dv), jnp.float32),    # unnormalized output acc
                pltpu.VMEM((tq, D), mm_dtype),        # pre-scaled q (written at kv==0)
            ],
        ),
        compiler_params=pltpu.CompilerParams(
            # B and Lq tiles are independent -> shardable across 2 TCs; the KV
            # axis is the online-softmax reduction -> arbitrary, last.
            dimension_semantics=("parallel", "parallel", "arbitrary"),
            vmem_limit_bytes=_VMEM_LIMIT_BYTES,
        ),
    )(q, k, v)

    return out if lq_pad == Lq else out[:, :Lq, :]


def dot_attention_ref(query, key, value):
    d = query.shape[-1]
    w = jnp.einsum("bqd,bkd->bqk", query.astype(jnp.float32),
                   key.astype(jnp.float32)) / math.sqrt(d)
    p = jax.nn.softmax(w, axis=-1)
    return jnp.einsum("bqk,bkv->bqv", p, value.astype(jnp.float32))


if __name__ == "__main__":
    rng = jax.random.PRNGKey(0)

    # f32 cases.
    cases = [
        # (B, Lq, Lk, D, Dv, kwargs)
        (2, 8, 16, 32, 32, {}),                                  # single tile / batch elem
        (2, 40, 100, 32, 32, dict(block_q=16, block_k=32)),      # multi-tile + KV-tail mask
        (1, 200, 640, 64, 64, {}),                               # B==1 split, multi-KV tiles
    ]
    for (B, Lq, Lk, D, Dv, kwargs) in cases:
        k1, k2, k3, rng = jax.random.split(rng, 4)
        q = jax.random.normal(k1, (B, Lq, D), dtype=jnp.float32)
        kk = jax.random.normal(k2, (B, Lk, D), dtype=jnp.float32)
        vv = jax.random.normal(k3, (B, Lk, Dv), dtype=jnp.float32)

        out = jax.block_until_ready(dot_attention(q, kk, vv, **kwargs))
        ref = dot_attention_ref(q, kk, vv)
        assert out.shape == ref.shape
        if not jnp.allclose(out, ref, atol=1e-4, rtol=1e-4):
            err = float(jnp.max(jnp.abs(out - ref)))
            raise AssertionError(
                f"mismatch vs reference for case {(B, Lq, Lk, D, Dv)}: max abs err {err}")

    # bf16 case (exercises 16-sublane tiling and bf16 MXU/exp inputs).
    k1, k2, k3, rng = jax.random.split(rng, 4)
    qb = jax.random.normal(k1, (2, 24, 64), dtype=jnp.bfloat16)
    kb = jax.random.normal(k2, (2, 48, 64), dtype=jnp.bfloat16)
    vb = jax.random.normal(k3, (2, 48, 64), dtype=jnp.bfloat16)
    outb = jax.block_until_ready(dot_attention(qb, kb, vb))
    refb = dot_attention_ref(qb, kb, vb)
    if not jnp.allclose(outb.astype(jnp.float32), refb, atol=5e-2, rtol=5e-2):
        err = float(jnp.max(jnp.abs(outb.astype(jnp.float32) - refb)))
        raise AssertionError(f"bf16 mismatch vs reference: max abs err {err}")

    # TODO(synk): self.dropout is defined in __init__ but never used in forward,
    # so no dropout is applied here (matches the PyTorch forward exactly).
    print("KERNEL_OK")
</pallas_src>

<mosaic_0001>
module attributes {stable_mosaic.version = 11 : i64} {
  func.func @_flash_attn_kernel(%arg0: i32, %arg1: i32, %arg2: i32, %arg3: memref<1x8x32xf32, #tpu.memory_space<vmem>>, %arg4: memref<1x16x32xf32, #tpu.memory_space<vmem>>, %arg5: memref<1x16x32xf32, #tpu.memory_space<vmem>>, %arg6: memref<1x8x32xf32, #tpu.memory_space<vmem>>, %arg7: memref<8x128xf32, #tpu.memory_space<vmem>>, %arg8: memref<8x128xf32, #tpu.memory_space<vmem>>, %arg9: memref<8x32xf32, #tpu.memory_space<vmem>>, %arg10: memref<8x32xf32, #tpu.memory_space<vmem>>) attributes {dimension_semantics = [#tpu.dimension_semantics<parallel>, #tpu.dimension_semantics<parallel>, #tpu.dimension_semantics<arbitrary>], iteration_bounds = array<i64: 2, 1, 1>, scalar_prefetch = 0 : i64, scratch_operands = 4 : i64, tpu.core_type = #tpu.core_type<tc>, window_params = [{transform_indices = @transform_0, window_bounds = array<i64: 1, 8, 32>}, {transform_indices = @transform_1, window_bounds = array<i64: 1, 16, 32>}, {transform_indices = @transform_2, window_bounds = array<i64: 1, 16, 32>}, {transform_indices = @transform_3, window_bounds = array<i64: 1, 8, 32>}]} {
    %c0_i32 = arith.constant 0 : i32
    %0 = arith.cmpi eq, %arg2, %c0_i32 : i32
    %1 = arith.extui %0 : i1 to i32
    %c0_i32_0 = arith.constant 0 : i32
    %2 = arith.cmpi ne, %1, %c0_i32_0 : i32
    scf.if %2 {
      %cst_25 = arith.constant 0xFF800000 : f32
      %36 = vector.broadcast %cst_25 : f32 to vector<8x128xf32>
      %c0_26 = arith.constant 0 : index
      %c0_27 = arith.constant 0 : index
      %37 = vector.load %arg7[%c0_26, %c0_27] : memref<8x128xf32, #tpu.memory_space<vmem>>, vector<8x128xf32>
      tpu.vector_store %arg7[%c0_26, %c0_27], %36 {strides = array<i32>} : memref<8x128xf32, #tpu.memory_space<vmem>>, vector<8x128xf32>,
      %cst_28 = arith.constant 0.000000e+00 : f32
      %38 = vector.broadcast %cst_28 : f32 to vector<8x128xf32>
      %c0_29 = arith.constant 0 : index
      %c0_30 = arith.constant 0 : index
      %39 = vector.load %arg8[%c0_29, %c0_30] : memref<8x128xf32, #tpu.memory_space<vmem>>, vector<8x128xf32>
      tpu.vector_store %arg8[%c0_29, %c0_30], %38 {strides = array<i32>} : memref<8x128xf32, #tpu.memory_space<vmem>>, vector<8x128xf32>,
      %cst_31 = arith.constant 0.000000e+00 : f32
      %40 = vector.broadcast %cst_31 : f32 to vector<8x32xf32>
      %c0_32 = arith.constant 0 : index
      %c0_33 = arith.constant 0 : index
      %41 = vector.load %arg9[%c0_32, %c0_33] : memref<8x32xf32, #tpu.memory_space<vmem>>, vector<8x32xf32>
      tpu.vector_store %arg9[%c0_32, %c0_33], %40 {strides = array<i32>} : memref<8x32xf32, #tpu.memory_space<vmem>>, vector<8x32xf32>,
      %c0_34 = arith.constant 0 : index
      %c0_35 = arith.constant 0 : index
      %c0_36 = arith.constant 0 : index
      %42 = vector.load %arg3[%c0_34, %c0_35, %c0_36] : memref<1x8x32xf32, #tpu.memory_space<vmem>>, vector<1x8x32xf32>
      %43 = vector.shape_cast %42 : vector<1x8x32xf32> to vector<8x32xf32>
      %cst_37 = arith.constant 0.176776692 : f32
      %44 = vector.broadcast %cst_37 : f32 to vector<8x32xf32>
      %45 = arith.mulf %43, %44 : vector<8x32xf32>
      %c0_38 = arith.constant 0 : index
      %c0_39 = arith.constant 0 : index
      %46 = vector.load %arg10[%c0_38, %c0_39] : memref<8x32xf32, #tpu.memory_space<vmem>>, vector<8x32xf32>
      tpu.vector_store %arg10[%c0_38, %c0_39], %45 {strides = array<i32>} : memref<8x32xf32, #tpu.memory_space<vmem>>, vector<8x32xf32>,
    } else {
    }
    %c0 = arith.constant 0 : index
    %c0_1 = arith.constant 0 : index
    %c0_2 = arith.constant 0 : index
    %3 = vector.load %arg4[%c0, %c0_1, %c0_2] : memref<1x16x32xf32, #tpu.memory_space<vmem>>, vector<1x16x32xf32>
    %4 = vector.shape_cast %3 : vector<1x16x32xf32> to vector<16x32xf32>
    %c0_3 = arith.constant 0 : index
    %c0_4 = arith.constant 0 : index
    %5 = vector.load %arg10[%c0_3, %c0_4] : memref<8x32xf32, #tpu.memory_space<vmem>>, vector<8x32xf32>
    %cst = arith.constant dense<0.000000e+00> : vector<8x16xf32>
    %6 = tpu.matmul %5, %4, %cst {dimension_numbers = #tpu.dot_dimension_numbers<[1], [1], [0], [0], [0, 0, 1, 0], [], []>} : vector<8x32xf32>, vector<16x32xf32>, vector<8x16xf32> -> vector<8x16xf32>
    %c0_5 = arith.constant 0 : index
    %c0_6 = arith.constant 0 : index
    %7 = vector.load %arg7[%c0_5, %c0_6] : memref<8x128xf32, #tpu.memory_space<vmem>>, vector<8x128xf32>
    %cst_7 = arith.constant dense<0xFF800000> : vector<8xf32>
    %8 = vector.multi_reduction <maximumf>, %6, %cst_7 [1] : vector<8x16xf32> to vector<8xf32>
    %9 = vector.shape_cast %8 : vector<8xf32> to vector<8x1xf32>
    %10 = vector.broadcast %9 : vector<8x1xf32> to vector<8x128xf32>
    %11 = arith.maximumf %7, %10 : vector<8x128xf32>
    %12 = arith.subf %7, %11 : vector<8x128xf32>
    %13 = math.exp %12 : vector<8x128xf32>
    %14 = vector.extract_strided_slice %11 {offsets = [0, 0], sizes = [8, 16], strides = [1, 1]} : vector<8x128xf32> to vector<8x16xf32>
    %15 = arith.subf %6, %14 : vector<8x16xf32>
    %16 = math.exp %15 : vector<8x16xf32>
    %c0_8 = arith.constant 0 : index
    %c0_9 = arith.constant 0 : index
    %17 = vector.load %arg8[%c0_8, %c0_9] : memref<8x128xf32, #tpu.memory_space<vmem>>, vector<8x128xf32>
    %18 = arith.mulf %13, %17 : vector<8x128xf32>
    %cst_10 = arith.constant dense<0.000000e+00> : vector<8xf32>
    %19 = vector.multi_reduction <add>, %16, %cst_10 [1] : vector<8x16xf32> to vector<8xf32>
    %20 = vector.shape_cast %19 : vector<8xf32> to vector<8x1xf32>
    %21 = vector.broadcast %20 : vector<8x1xf32> to vector<8x128xf32>
    %22 = arith.addf %18, %21 : vector<8x128xf32>
    %c0_11 = arith.constant 0 : index
    %c0_12 = arith.constant 0 : index
    %23 = vector.load %arg8[%c0_11, %c0_12] : memref<8x128xf32, #tpu.memory_space<vmem>>, vector<8x128xf32>
    tpu.vector_store %arg8[%c0_11, %c0_12], %22 {strides = array<i32>} : memref<8x128xf32, #tpu.memory_space<vmem>>, vector<8x128xf32>,
    %c0_13 = arith.constant 0 : index
    %c0_14 = arith.constant 0 : index
    %c0_15 = arith.constant 0 : index
    %24 = vector.load %arg5[%c0_13, %c0_14, %c0_15] : memref<1x16x32xf32, #tpu.memory_space<vmem>>, vector<1x16x32xf32>
    %25 = vector.shape_cast %24 : vector<1x16x32xf32> to vector<16x32xf32>
    %cst_16 = arith.constant dense<0.000000e+00> : vector<8x32xf32>
    %26 = tpu.matmul %16, %25, %cst_16 {dimension_numbers = #tpu.dot_dimension_numbers<[1], [0], [0], [1], [0, 0, 1, 1], [], []>} : vector<8x16xf32>, vector<16x32xf32>, vector<8x32xf32> -> vector<8x32xf32>
    %27 = vector.extract_strided_slice %13 {offsets = [0, 0], sizes = [8, 32], strides = [1, 1]} : vector<8x128xf32> to vector<8x32xf32>
    %c0_17 = arith.constant 0 : index
    %c0_18 = arith.constant 0 : index
    %28 = vector.load %arg9[%c0_17, %c0_18] : memref<8x32xf32, #tpu.memory_space<vmem>>, vector<8x32xf32>
    %29 = arith.mulf %27, %28 : vector<8x32xf32>
    %30 = arith.addf %29, %26 : vector<8x32xf32>
    %c0_19 = arith.constant 0 : index
    %c0_20 = arith.constant 0 : index
    %31 = vector.load %arg9[%c0_19, %c0_20] : memref<8x32xf32, #tpu.memory_space<vmem>>, vector<8x32xf32>
    tpu.vector_store %arg9[%c0_19, %c0_20], %30 {strides = array<i32>} : memref<8x32xf32, #tpu.memory_space<vmem>>, vector<8x32xf32>,
    %c0_21 = arith.constant 0 : index
    %c0_22 = arith.constant 0 : index
    %32 = vector.load %arg7[%c0_21, %c0_22] : memref<8x128xf32, #tpu.memory_space<vmem>>, vector<8x128xf32>
    tpu.vector_store %arg7[%c0_21, %c0_22], %11 {strides = array<i32>} : memref<8x128xf32, #tpu.memory_space<vmem>>, vector<8x128xf32>,
    %c0_i32_23 = arith.constant 0 : i32
    %33 = arith.cmpi eq, %arg2, %c0_i32_23 : i32
    %34 = arith.extui %33 : i1 to i32
    %c0_i32_24 = arith.constant 0 : i32
    %35 = arith.cmpi ne, %34, %c0_i32_24 : i32
    scf.if %35 {
      %c0_25 = arith.constant 0 : index
      %c0_26 = arith.constant 0 : index
      %36 = vector.load %arg8[%c0_25, %c0_26] : memref<8x128xf32, #tpu.memory_space<vmem>>, vector<8x128xf32>
      %37 = tpu.reciprocal %36 {approx = true} : vector<8x128xf32> -> vector<8x128xf32>
      %38 = arith.mulf %36, %37 : vector<8x128xf32>
      %cst_27 = arith.constant 2.000000e+00 : f32
      %39 = vector.broadcast %cst_27 : f32 to vector<8x128xf32>
      %40 = arith.subf %39, %38 : vector<8x128xf32>
      %41 = arith.mulf %37, %40 : vector<8x128xf32>
      %c0_28 = arith.constant 0 : index
      %c0_29 = arith.constant 0 : index
      %42 = vector.load %arg9[%c0_28, %c0_29] : memref<8x32xf32, #tpu.memory_space<vmem>>, vector<8x32xf32>
      %43 = vector.extract_strided_slice %41 {offsets = [0, 0], sizes = [8, 32], strides = [1, 1]} : vector<8x128xf32> to vector<8x32xf32>
      %44 = arith.mulf %42, %43 : vector<8x32xf32>
      %c0_30 = arith.constant 0 : index
      %c0_31 = arith.constant 0 : index
      %c0_32 = arith.constant 0 : index
      %45 = vector.load %arg6[%c0_30, %c0_31, %c0_32] : memref<1x8x32xf32, #tpu.memory_space<vmem>>, vector<1x8x32xf32>
      %46 = vector.shape_cast %45 : vector<1x8x32xf32> to vector<8x32xf32>
      %47 = vector.shape_cast %44 : vector<8x32xf32> to vector<1x8x32xf32>
      tpu.vector_store %arg6[%c0_30, %c0_31, %c0_32], %47 {strides = array<i32>} : memref<1x8x32xf32, #tpu.memory_space<vmem>>, vector<1x8x32xf32>,
    } else {
    }
    return
  }
  func.func @transform_0(%arg0: i32, %arg1: i32, %arg2: i32) -> (i32, i32, i32) {
    %c0_i32 = arith.constant 0 : i32
    %c0_i32_0 = arith.constant 0 : i32
    return %arg0, %arg1, %c0_i32 : i32, i32, i32
  }
  func.func @transform_1(%arg0: i32, %arg1: i32, %arg2: i32) -> (i32, i32, i32) {
    %c0_i32 = arith.constant 0 : i32
    %c0_i32_0 = arith.constant 0 : i32
    return %arg0, %arg2, %c0_i32 : i32, i32, i32
  }
  func.func @transform_2(%arg0: i32, %arg1: i32, %arg2: i32) -> (i32, i32, i32) {
    %c0_i32 = arith.constant 0 : i32
    %c0_i32_0 = arith.constant 0 : i32
    return %arg0, %arg2, %c0_i32 : i32, i32, i32
  }
  func.func @transform_3(%arg0: i32, %arg1: i32, %arg2: i32) -> (i32, i32, i32) {
    %c0_i32 = arith.constant 0 : i32
    %c0_i32_0 = arith.constant 0 : i32
    return %arg0, %arg1, %c0_i32 : i32, i32, i32
  }
}

</mosaic_0001>

<bundles_post_ra>
// kernel: tpu_custom_call.1
= control target key start
LH: loop header
LB: loop body
LE: loop exit
PB: predicated region body
PF: predicated region fallthrough
CT: control target
= control target key end

     0   :  { %s1184_s0 = inlined_call_operand.hbm [shape: f32[2,8,32], index: 0, kind: input, shape index: {}]   ;;  %s1185_s1 = inlined_call_operand.hbm [shape: f32[2,16,32], index: 1, kind: input, shape index: {}]   ;;  %s1186_s2 = inlined_call_operand.hbm [shape: f32[2,16,32], index: 2, kind: input, shape index: {}]   ;;  %s1187_s3 = inlined_call_operand.hbm [shape: f32[2,8,32], index: 3, kind: output, shape index: {}]  }
   0x1   :  { %1191 = sst [smem:[#allocation19_spill]] %s1185_s1 }
   0x2   :  { %8 = vsyncpa [#allocation7], 0 }
   0x3   :  { %10 = vsyncpa [#allocation7 + $0x1], 0 }
   0x4   :  { %11 = vsyncpa [#allocation10], 0 }
   0x5   :  { %13 = vsyncpa [#allocation10 + $0x1], 0 }
   0x6   :  { %14 = vsyncpa [#allocation8], 0 }
   0x7   :  { %16 = vsyncpa [#allocation8 + $0x1], 0  ;;  %s975_s12 = smov 0   ;;  %s977_s13 = smov 0  }
   0x8   :  { %s979_s14 = smov 0   ;;  %s981_s15 = smov 0  }
   0x9   :  { %s983_s16 = smov 0   ;;  %s985_s17 = smov 0  }
   0xa LB: > { %1192 = sst [smem:[#allocation16_spill]] %s933_s14  ;;  %s1006_s18 = sadd.s32 4294967295, %s945_s17   ;;  %s945_s17 = sphi %s985_s17, %s22_s17   ;;  %s941_s16 = sphi %s983_s16, %s1210_s16   ;;  %s937_s15 = sphi %s981_s15, %s1209_s15   ;;  %s933_s14 = sphi %s979_s14, %s1205_s14   ;;  %s929_s13 = sphi %s977_s13, %s1208_s13   ;;  %s925_s12 = sphi %s975_s12, %s1207_s12  }
   0xb   : > { %s649_s19 = sadd.s32 4294967294, %s945_s17   ;;  %s41_s20 = sadd.s32 1, %s941_s16 }
   0xc   : > { %s50_s21 = sadd.s32 1, %s933_s14  ;;  %p43_p0 = scmp.ge.s32.totalorder %s41_s20, 2 }
   0xd   : > { %p57_p1 = scmp.ne.s32.totalorder %s933_s14, %s929_s13  ;;  %p58_p2 = scmp.eq.s32.totalorder %s945_s17, 0 }
   0xe   : > { %p63_p3 = scmp.ne.s32.totalorder %s929_s13, %s925_s12  ;;  %s1212_s20 = smov (%p43_p0, %s41_s20), 0 }
   0xf   : > { %1193 = sst [smem:[#allocation17_spill]] %s1212_s20  ;;  %p1018_p4 = por %p58_p2, %p57_p1 }
  0x10   : > { %p64_p5 = scmp.eq.s32.totalorder %s1006_s18, 0  ;;  %s45_s23 = ssub.s32 %s941_s16, %s1212_s20 }
  0x11   : > { %p145_p6 = scmp.eq.s32.totalorder %s1006_s18, 1  ;;  %p48_p7 = scmp.eq.s32.totalorder %s45_s23, 0 }
  0x12   : > { %p1026_p8 = por %p64_p5, %p63_p3  ;;  %p151_p10 = scmp.eq.s32.totalorder %s649_s19, 1 }
  0x13   : > { %p1030_p9 = por %p145_p6, %p57_p1  ;;  %p717_p13 = scmp.lt.s32.totalorder %s945_s17, 2 }
  0x14   : > { %s1035_s26 = scalar_select %p48_p7, %s933_s14, %s50_s21  }
  0x15   : > { %p1037_p11 = por %p151_p10, %p63_p3  ;;  %s1044_s28 = sand.u32 1, %s933_s14  }
  0x16   : > { %1197 = sst [smem:[#allocation18_spill]] %s1035_s26  ;;  %s190_s29 = sand.u32 1, %s945_s17  }
  0x17   : > { %s654_s30 = sshll.u32 %s1044_s28, 4  ;;  %p1050_p0 = pnand %p717_p13, %p1018_p4 }
  0x18   : > { %s673_s5 = sshll.u32 %s941_s16, 8  ;;  %s1200_s1 = sld [smem:[#allocation19_spill]] }
  0x19   : > { %s194_s9 = scalar_lea.vmem [#allocation9], %s654_s30  ;;  %s1060_s11 = scalar_lea.sflag [#allocation10], %s190_s29 }
  0x1a   : > { %s203_s10 = sshll.u32 %s194_s9, 4  ;;  %p779_p1 = pneg %p1050_p0  ;;  %s204_s10 = int_to_ptr.vmem [resolvable:$true] %s203_s10 }
  0x1b   : > { %s790_s19 = scalar_lea.vmem %s204_s10, 256  ;;  %s947_s21 = smov [#allocation9]  }
  0x1c   : > { %p791_p2 = scmp.ne.s32.totalorder %s204_s10, %s790_s19  ;;  %s795_s22 = sshll.u32 %s947_s21, 4  ;;  %s796_s22 = int_to_ptr.vmem [resolvable:$false] %s795_s22 }
  0x1d   : > { %s797_s23 = scalar_lea.vmem %s796_s22, 512  ;;  %p798_p5 = scmp.lt.s32.totalorder %s204_s10, %s796_s22 }
  0x1e   : > { %s202_s8 = scalar_lea.hbm %s1200_s1, %s673_s5  ;;  %p793_p3 = pnand %p791_p2, %p779_p1 }
  0x1f   : > { %p799_p6 = scmp.lt.s32.totalorder %s797_s23, %s790_s19 }
  0x20   : > { %p794_p4 = pneg %p793_p3 }
  0x21   : > { %p800_p7 = por %p799_p6, %p798_p5 }
  0x23   : > { %p801_p10 = pnand %p800_p7, %p794_p4 }
  0x25   : > { %804 = shalt.err (!%p801_p10)
}
  0x26   : > { %s1190_s6 = smov 128   ;;  %s949_s29 = smov 8  }
  0x27   : > { %709 = dma.hbm_to_vmem [thread:$0]  (!%p1050_p0), %s202_s8, 256, %s204_s10, %s1060_s11, %s1190_s6, %s1190_s6, %s949_s29  }
  0x28   : > { %s1076_s19 = scalar_lea.hbm %s1186_s2, %s673_s5  ;;  %p660_p13 = scmp.ge.s32.totalorder %s945_s17, 1 }
  0x29   : > { %s217_s21 = scalar_lea.vmem [#allocation11], %s654_s30  ;;  %p234_p2 = scmp.lt.s32.totalorder %s945_s17, 3 }
  0x2a   : > { %s226_s22 = sshll.u32 %s217_s21, 4  ;;  %s652_s1 = sshll.u32 %s1044_s28, 3  ;;  %s1091_s22 = int_to_ptr.vmem [resolvable:$true] %s226_s22 }
  0x2b   : > { %p1082_p3 = pnand %p660_p13, %p234_p2  ;;  %s653_s20 = sshll.u32 %s941_s16, 7 }
  0x2c   : > { %s181_s8 = scalar_lea.hbm %s1184_s0, %s653_s20  ;;  %s175_s5 = scalar_lea.vmem [#allocation6], %s652_s1 }
  0x2d   : > { %s183_s10 = sshll.u32 %s175_s5, 4  ;;  %s172_s7 = scalar_lea.sflag [#allocation7], %s1044_s28  ;;  %s184_s10 = int_to_ptr.vmem [resolvable:$true] %s183_s10 }
  0x2e   : > { %s818_s9 = scalar_lea.vmem %s184_s10, 128  ;;  %s950_s30 = smov [#allocation6]  }
  0x2f   : > { %p819_p4 = scmp.ne.s32.totalorder %s184_s10, %s818_s9  ;;  %s823_s21 = sshll.u32 %s950_s30, 4  ;;  %s824_s21 = int_to_ptr.vmem [resolvable:$false] %s823_s21 }
  0x30   : > { %s825_s6 = scalar_lea.vmem %s824_s21, 256  ;;  %p826_p7 = scmp.lt.s32.totalorder %s184_s10, %s824_s21 }
  0x31   : > { %p821_p5 = pnand %p819_p4, %p779_p1  ;;  %p827_p10 = scmp.lt.s32.totalorder %s825_s6, %s818_s9 }
  0x33   : > { %p822_p6 = pneg %p821_p5  ;;  %p828_p13 = por %p827_p10, %p826_p7 }
  0x35   : > { %p829_p2 = pnand %p828_p13, %p822_p6 }
  0x37   : > { %832 = shalt.err (!%p829_p2)
}
  0x38   : > { %706 = dma.hbm_to_vmem [thread:$0]  (!%p1050_p0), %s181_s8, 128, %s184_s10, %s172_s7  }
  0x39   : > { %s846_s1 = scalar_lea.vmem %s1091_s22, 256  ;;  %s951_s14 = smov [#allocation11]  }
  0x3a   : > { %p847_p12 = scmp.ne.s32.totalorder %s1091_s22, %s846_s1  ;;  %s851_s20 = sshll.u32 %s951_s14, 4  ;;  %s852_s20 = int_to_ptr.vmem [resolvable:$false] %s851_s20 }
  0x3b   : > { %s853_s26 = scalar_lea.vmem %s852_s20, 512  ;;  %p854_p7 = scmp.lt.s32.totalorder %s1091_s22, %s852_s20 }
  0x3c   : > { %p849_p4 = pnand %p847_p12, %p779_p1  ;;  %p855_p6 = scmp.lt.s32.totalorder %s853_s26, %s846_s1 }
  0x3e   : > { %p850_p5 = pneg %p849_p4  ;;  %p856_p10 = por %p855_p6, %p854_p7 }
  0x40   : > { %p857_p13 = pnand %p856_p10, %p850_p5 }
  0x42   : > { %860 = shalt.err (!%p857_p13)
}
  0x43   : > { %s1202_s28 = smov 128   ;;  %238 = sbr.rel (%p1082_p3) target bundleno = 655 (0x28f), region = 32 }
  0x44   : > { %712 = dma.hbm_to_vmem [thread:$0]  (!%p1050_p0), %s1076_s19, 256, %s1091_s22, %s1060_s11, %s1202_s28, %s1202_s28, %s949_s29  }
  0x45   : > { %s1116_s6 = sand.u32 (!%p1082_p3), 1, %s929_s13  }
  0x46   : > { %s661_s8 = sshll.u32 (!%p1082_p3), %s1116_s6, 3  ;;  %s241_s5 = scalar_lea.sflag (!%p1082_p3), [#allocation7], %s1116_s6 }
  0x47   : > { %s244_s4 = scalar_lea.vmem (!%p1082_p3), [#allocation6], %s661_s8 }
  0x48   : > { %912 = dma.done.wait (%p1026_p8), %s241_s5, 128  }
  0x49   : > { %914 = vsyncadd (%p1026_p8), %s241_s5, 4294967168  ;;  %s249_s11 = sand.u32 1, %s1006_s18   ;;  %s662_s29 = sshll.u32 %s1116_s6, 4 }
  0x4a   : > { %s250_s19 = scalar_lea.sflag [#allocation10], %s249_s11  ;;  %s253_s22 = scalar_lea.vmem [#allocation9], %s662_s29 }
  0x4b   : > { %916 = dma.done.wait (%p1026_p8), %s250_s19, 512  }
  0x4c   : > { %918 = vsyncadd (%p1026_p8), %s250_s19, 4294966784  ;;  %vm303_vm0 = vcmask 261120   ;;  %v952_v0 = vmov 0.0   ;;  %vm953_vm1 = vmmov 0   ;;  %v305_v1 = vld [vmem:[%s244_s4] sm:$0xff]  ;;  %v308_v4 = vld [vmem:[%s253_s22] sm:$0xff] }
  0x4d   : > { %681 = vmatprep.subr.mxu0 %v952_v0  ;;  %304 = vst.msk [vmem:[#allocation4] sm:$0xff] %vm303_vm0, %v952_v0  ;;  %685 = vmatprep.mubr.msk.f32.mxu0 %vm953_vm1, %v952_v0  ;;  %v309_v2 = vld [vmem:[%s253_s22 + $0x8] sm:$0xff]  ;;  %v306_v3 = vmul.f32 0.17677669, %v305_v1  ;;  %vm392_vm2 = vcmask 130048   ;;  %s262_s18 = scalar_lea.vmem [#allocation11], %s662_s29 }
  0x4e   : > { %688 = vmatprep.subr.mxu1 %v952_v0  ;;  %692 = vmatprep.mubr.msk.f32.mxu1 %vm953_vm1, %v952_v0  ;;  %v411_v9 = vld [vmem:[%s262_s18 + $0x8] sm:$0xff]  ;;  %v410_v10 = vld [vmem:[%s262_s18] sm:$0xff]  ;;  %s670_s24 = sshll.u32 %s937_s15, 7  ;;  %s294_s23 = scalar_lea.vmem [#allocation12], %s661_s8 }
  0x4f   : > { %682 = vmatpush3.xpose.msk.msra.mxu0 %vm303_vm0, %v309_v2  ;;  %307 = vst.msk [vmem:[#allocation5] sm:$0xff] %vm303_vm0, %v306_v3  ;;  %689 = vmatpush3.msra.mxu1 %v411_v9  ;;  %s516_s10 = sshll.u32 %s294_s23, 4  ;;  %s514_s30 = scalar_lea.hbm %s1187_s3, %s670_s24  ;;  %s517_s10 = int_to_ptr.vmem [resolvable:$true] %s516_s10 }
  0x50   : > { %683 = vmatprep.subr.mxu0 %v952_v0  ;;  %690 = vmatprep.subr.mxu1 %v952_v0  ;;  %s502_s21 = scalar_lea.sflag [#allocation8], %s1116_s6  ;;  %s861_s1 = scalar_lea.vmem %s517_s10, 128 }
  0x51   : > { %691 = vmatpush3.msra.mxu1 %v410_v10  ;;  %p862_p8 = scmp.ne.s32.totalorder %s517_s10, %s861_s1  ;;  %s954_s15 = smov [#allocation12]  }
  0x52   : > { %s865_s14 = sshll.u32 %s954_s15, 4  ;;  %s866_s14 = int_to_ptr.vmem [resolvable:$false] %s865_s14 }
  0x53   : > { %684 = vmatpush3.xpose.msk.msra.mxu0 %vm303_vm0, %v308_v4  ;;  %p863_p12 = pnand %p862_p8, %p1030_p9  ;;  %s867_s20 = scalar_lea.vmem %s866_s14, 256 }
  0x54   : > { %v485_v22 = vld [vmem:[#allocation4] sm:$0xff]  ;;  %p868_p1 = scmp.lt.s32.totalorder %s517_s10, %s866_s14  ;;  %p869_p3 = scmp.lt.s32.totalorder %s867_s20, %s861_s1 }
  0x55   : > { %p864_p0 = pneg %p863_p12 }
  0x56   : > { %v310_v5 = vld [vmem:[#allocation5] sm:$0xff]  ;;  %p870_p2 = por %p869_p3, %p868_p1 }
  0x57   : > { %686 = vmatmul.mubr.msk.f32.vlgmr.msra.gmra.mxu0 %vm303_vm0, %v310_v5 }
  0x58   : > { %p871_p4 = pnand %p870_p2, %p864_p0 }
 0x117   : > { %v387_v6 = vpop.f32.mrf.mxu0 }
 0x118   : > { %v393_v7 = vsel %vm392_vm2, %v387_v6, -inf }
 0x119   : > { %394 = vmax.xlane.f32.xlu0 %v393_v7  ;;  %v687_v8 = vpop.f32.mrf.mxu0 }
 0x1a2   : > { %v395_v11 = vpop.xlane.xlu0 %394 }
 0x1a3   : > { %v400_v12 = vsub.f32 %v387_v6, %v395_v11  ;;  %v397_v16 = vsub.f32 -inf, %v395_v11 }
 0x1a5   : > { %v401_v13 = vmul.f32 1.442695, %v400_v12  ;;  %v398_v17 = vmul.f32 1.442695, %v397_v16 }
 0x1a7   : > { %771 = vpow2.f32 %v401_v13 }
 0x1a8   : > { %773 = vpow2.f32 %v398_v17 }
 0x1b4   : > { %v772_v14 = vpop.eup %771 }
 0x1b5   : > { %693 = vmatmul.mubr.msk.f32.vlgmr.msra.gmra.mxu1 %vm392_vm2, %v772_v14  ;;  %v405_v15 = vsel %vm392_vm2, %v772_v14, 0.0  ;;  %v774_v18 = vpop.eup %773 }
 0x1b6   : > { %406 = vadd.xlane.f32.xlu0 %v405_v15  ;;  %v404_v20 = vmul.f32 0.0, %v774_v18  ;;  %v486_v24 = vmul.f32 %v774_v18, %v485_v22 }
 0x23f   : > { %v407_v19 = vpop.xlane.xlu0 %406 }
 0x240   : > { %v408_v21 = vadd.f32 %v407_v19, %v404_v20 }
 0x242   : > { %775 = vrcp.f32 %v408_v21 }
 0x24f   : > { %v776_v23 = vpop.eup %775 }
 0x250   : > { %v495_v26 = vmul.f32 %v776_v23, %v408_v21 }
 0x252   : > { %v496_v29 = vsub.f32 2.0, %v495_v26 }
 0x254   : > { %v497_v30 = vmul.f32 %v776_v23, %v496_v29 }
 0x275   : > { %v481_v25 = vpop.f32.mrf.mxu1 }
 0x276   : > { %v487_v27 = vadd.f32 %v486_v24, %v481_v25 }
 0x277   : > { %v694_v28 = vpop.f32.mrf.mxu1 }
 0x278   : > { %488 = vst.msk [vmem:[#allocation4] sm:$0xff] %vm303_vm0, %v487_v27 }
 0x27f   : > { %v498_v31 = vld [vmem:[#allocation4] sm:$0xff] }
 0x280   : > { %v499_v32 = vmul.f32 %v498_v31, %v497_v30 }
 0x282   : > { %500 = vst.msk [vmem:[%s294_s23] sm:$0xff] %vm303_vm0, %v499_v32 }
 0x283   : > { %874 = shalt.err (!%p871_p4)
}
 0x284   : > { %s875_s26 = scalar_lea.hbm %s514_s30, 128  ;;  %s879_s8 = scalar_lea.hbm %s1187_s3, 256 }
 0x285   : > { %p876_p5 = scmp.ne.s32.totalorder %s514_s30, %s875_s26  ;;  %p880_p10 = scmp.lt.s32.totalorder %s514_s30, %s1187_s3 }
 0x286   : > { %p881_p13 = scmp.lt.s32.totalorder %s879_s8, %s875_s26 }
 0x287   : > { %p877_p7 = pnand %p876_p5, %p1030_p9 }
 0x288   : > { %p882_p8 = por %p881_p13, %p880_p10 }
 0x289   : > { %p878_p6 = pneg %p877_p7 }
 0x28b   : > { %p883_p12 = pnand %p882_p8, %p878_p6 }
 0x28d   : > { %886 = shalt.err (!%p883_p12)
}
 0x28e   : > { %701 = dma.vmem_to_hbm [thread:$0]  (%p1030_p9), %s517_s10, 128, %s514_s30, %s502_s21  }
 0x28f PF: > { %s528_s11 = sand.u32 1, %s925_s12   ;;  %p1203_p0 = scmp.ge.s32.totalorder %s945_s17, 2 }
 0x290   : > { %s529_s29 = scalar_lea.sflag [#allocation8], %s528_s11 }
 0x291   : > { %p714_p1 = pnand %p1203_p0, %p1037_p11 }
 0x293   : > { %p715_p3 = pneg %p714_p1 }
 0x295   : > { %920 = dma.done.wait (%p715_p3), %s529_s29, 128  }
 0x296   : > { %922 = vsyncadd (%p715_p3), %s529_s29, 4294967168  ;;  %s22_s17 = sadd.s32 1, %s945_s17   ;;  %s1204_s19 = sld [smem:[#allocation16_spill]] }
 0x297   : > { %p19_p2 = scmp.ge.s32.totalorder %s22_s17, 4   ;;  %s1205_s14 = sld [smem:[#allocation18_spill]] }
 0x298   : > { %s1206_s25 = sld [smem:[#allocation17_spill]]  ;;  %s1207_s12 = smov %s929_s13 }
 0x299   : > { %s1209_s15 = smov %s941_s16 }
 0x29a   :  { %21 = sbr.rel (!%p19_p2) target bundleno = 10 (0xa), region = 109 }
 0x29c   : > { %s1208_s13 = smov %s1204_s19 }
 0x29e   : > { %s1210_s16 = smov %s1206_s25 }
 0x29f   :  { %534 = vsyncpa [#allocation7], 1 }
 0x2a0   :  { %536 = vsyncpa [#allocation7 + $0x1], 1 }
 0x2a1   :  { %537 = vsyncpa [#allocation10], 1 }
 0x2a2   :  { %539 = vsyncpa [#allocation10 + $0x1], 1 }
 0x2a3   :  { %540 = vsyncpa [#allocation8], 1 }
 0x2a4   :  { %542 = vsyncpa [#allocation8 + $0x1], 1 }

</bundles_post_ra>
